<compile_context>
chip_gen: v7x
topology: tpu7x:2x2x1
jax: 0.10.0
libtpu: 0.0.40
codegen_flags: <defaults>
</compile_context>

<pallas_src>
import functools

import jax
import jax.numpy as jnp
from jax.experimental import pallas as pl
from jax.experimental.pallas import tpu as pltpu


_C_CHUNK = 1024                                  # class-chunk width (grid-tiled)
_VMEM_LIMIT_BYTES = 48 * 1024 * 1024             # scoped cap, safe on v7x (64 MiB)
_VMEM_BUDGET_BYTES = (3 * _VMEM_LIMIT_BYTES) // 4
_LOGITS_BUF_TARGET = 4 * 1024 * 1024             # per (double-buffered) logits buffer


def _focal_loss_kernel(x_ref, t_ref, o_ref, acc_ref, m_ref, s_ref, g_ref, *,
                       n_total, tile_n, n_classes, tiles_per_split,
                       need_row_mask, need_col_mask, single_class_tile):
    split = pl.program_id(0)
    i = pl.program_id(1)           # row-tile index within this split
    k = pl.program_id(2)           # class-chunk index
    num_k = pl.num_programs(2)

    @pl.when(jnp.logical_and(i == 0, k == 0))
    def _init_acc():
        acc_ref[...] = jnp.zeros_like(acc_ref)

    x = x_ref[...]                 # (tile_n, cw) logits, caller dtype (bf16 ok)
    t = t_ref[...]                 # (tile_n, 1) int32 targets
    cw = x.shape[-1]

    col = jax.lax.broadcasted_iota(jnp.int32, (tile_n, cw), 1) + k * cw
    # Target-class logit: one-hot select + sum, exact in the input dtype.
    g_chunk = jnp.sum(jnp.where(col == t, x, 0), axis=-1,
                      keepdims=True).astype(jnp.float32)
    if need_col_mask:
        # Partial last class chunk: neutralize padded columns before max/exp.
        x = jnp.where(col < n_classes, x, -jnp.inf)
    cm = jnp.max(x, axis=-1, keepdims=True).astype(jnp.float32)   # chunk max

    if single_class_tile:
        # Whole class dim in one chunk: no carried state, one exp pass.
        m_new = cm
        e = jnp.exp(x.astype(jnp.float32) - m_new)
        s_new = jnp.sum(e, axis=-1, keepdims=True)
        g_new = g_chunk
    else:
        # Online logsumexp across class chunks; state lives in VMEM scratch.
        @pl.when(k == 0)
        def _init_state():
            m_ref[...] = jnp.full_like(m_ref, -jnp.inf)
            s_ref[...] = jnp.zeros_like(s_ref)
            g_ref[...] = jnp.zeros_like(g_ref)

        m_old = m_ref[...]
        m_new = jnp.maximum(m_old, cm)
        e = jnp.exp(x.astype(jnp.float32) - m_new)
        s_new = s_ref[...] * jnp.exp(m_old - m_new) + jnp.sum(
            e, axis=-1, keepdims=True)
        g_new = g_ref[...] + g_chunk
        m_ref[...] = m_new
        s_ref[...] = s_new
        g_ref[...] = g_new

    @pl.when(k == num_k - 1)
    def _accumulate_rows():
        nll = (jnp.log(s_new) + m_new) - g_new                    # (tile_n, 1)
        if need_row_mask:
            # Mask rows beyond N (partial last tile / overshoot of a core split).
            row0 = (split * tiles_per_split + i) * tile_n
            row = jax.lax.broadcasted_iota(jnp.int32, (tile_n, 1), 0) + row0
            nll = jnp.where(row < n_total, nll, 0.0)
        acc_ref[...] += jnp.sum(nll, axis=0, keepdims=True)       # (1, 1)

    @pl.when(jnp.logical_and(i == pl.num_programs(1) - 1, k == num_k - 1))
    def _finalize():
        o_ref[...] = acc_ref[...].reshape(1, 1, 1)


def _pick_tile_n(n, c, itemsize):
    """Rows per tile, sized purely by bytes (no fixed row cap)."""
    eff_c = min(c, _C_CHUNK)                 # streamed block width (class chunk)
    stream_row = eff_c * itemsize            # logits bytes per row per chunk
    # ~3 chunk-width f32 temporaries (upcast / exp / select) plus ~8 live
    # (tile_n, 1) f32 column vectors (online-lse state, nll, ...) which are
    # lane-padded to 512 B/row in VMEM.
    temp_row = 3 * eff_c * 4 + 8 * 512
    rows = min(_LOGITS_BUF_TARGET // max(1, stream_row),
               _VMEM_BUDGET_BYTES // max(1, 2 * stream_row + temp_row))
    if rows >= n:
        return n                             # single full-extent tile (always legal)
    rows = max(8, (rows // 16) * 16)         # 16-row granule; 8 is the legal floor
    return min(rows, n)


def focal_loss(logits, targets, gamma=0.0, eps=1e-07, tile_n=None,
               num_splits=None):
    """logits: (N, C) float32/bfloat16; targets: (N,) int. Returns scalar f32."""
    del eps  # unused in the PyTorch forward pass as well
    n, c = logits.shape
    t2d = targets.astype(jnp.int32).reshape(n, 1)
    itemsize = jnp.dtype(logits.dtype).itemsize

    if tile_n is None:
        tile_n = _pick_tile_n(n, c, itemsize)
    c_block = min(c, _C_CHUNK)
    n_tiles = pl.cdiv(n, tile_n)
    c_tiles = pl.cdiv(c, c_block)
    if num_splits is None:
        num_splits = 2 if n_tiles >= 2 else 1     # one split per v7x TensorCore
    tiles_per_split = pl.cdiv(n_tiles, num_splits)

    need_row_mask = num_splits * tiles_per_split * tile_n != n
    need_col_mask = c_tiles * c_block != c

    def row_idx(s, i):
        # Clamp so an overshooting final step of a split re-reads a valid block;
        # its rows are zeroed in-kernel by the `row < n_total` mask.
        return jnp.minimum(s * tiles_per_split + i, n_tiles - 1)

    kernel = functools.partial(
        _focal_loss_kernel,
        n_total=n, tile_n=tile_n, n_classes=c, tiles_per_split=tiles_per_split,
        need_row_mask=need_row_mask, need_col_mask=need_col_mask,
        single_class_tile=(c_tiles == 1))

    partials = pl.pallas_call(
        kernel,
        out_shape=jax.ShapeDtypeStruct((num_splits, 1, 1), jnp.float32),
        grid_spec=pltpu.PrefetchScalarGridSpec(
            num_scalar_prefetch=0,
            grid=(num_splits, tiles_per_split, c_tiles),
            in_specs=[
                # Logits stream in the caller's dtype (bf16 stays bf16 in HBM).
                pl.BlockSpec((tile_n, c_block),
                             lambda s, i, k: (row_idx(s, i), k)),
                # Targets: same row block for every class chunk (DMA'd once).
                pl.BlockSpec((tile_n, 1),
                             lambda s, i, k: (row_idx(s, i), 0)),
            ],
            out_specs=pl.BlockSpec((1, 1, 1), lambda s, i, k: (s, 0, 0)),
            scratch_shapes=[
                pltpu.VMEM((1, 1), jnp.float32),       # per-split running NLL sum
                pltpu.VMEM((tile_n, 1), jnp.float32),  # online-lse running max
                pltpu.VMEM((tile_n, 1), jnp.float32),  # online-lse running sum
                pltpu.VMEM((tile_n, 1), jnp.float32),  # running target logit
            ]),
        compiler_params=pltpu.CompilerParams(
            dimension_semantics=("parallel", "arbitrary", "arbitrary"),
            vmem_limit_bytes=_VMEM_LIMIT_BYTES),
    )(logits, t2d)

    # Mean NLL + focal modulation: a handful of scalar ops, done in plain JAX
    # (matches the PyTorch module: scalar CE first, then (1 - pt)**gamma * logpt).
    logpt = jnp.sum(partials) / jnp.float32(n)
    pt = jnp.exp(-logpt)
    if gamma == 0.0:
        return logpt
    return jnp.power(jnp.float32(1.0) - pt, jnp.float32(gamma)) * logpt


def _focal_loss_ref(logits, targets, gamma=0.0):
    # Pure-JAX reference for a correctness sanity check.
    logp = jax.nn.log_softmax(logits.astype(jnp.float32), axis=-1)
    nll = -jnp.take_along_axis(logp, targets[:, None].astype(jnp.int32), axis=-1)
    logpt = jnp.mean(nll)
    pt = jnp.exp(-logpt)
    return (1.0 - pt) ** gamma * logpt


if __name__ == "__main__":
    key = jax.random.PRNGKey(0)
    k1, k2, k3, k4, k5, k6 = jax.random.split(key, 6)
    gamma = 2.0  # exercise the focal modulation (module default is 0)

    # Case 1: small f32 problem -> single full-extent tile, single split.
    N, C = 8, 16
    logits = jax.random.normal(k1, (N, C), dtype=jnp.float32)
    targets = jax.random.randint(k2, (N,), 0, C, dtype=jnp.int32)
    out = jax.block_until_ready(focal_loss(logits, targets, gamma=gamma))
    ref = _focal_loss_ref(logits, targets, gamma=gamma)
    assert jnp.allclose(out, ref, rtol=1e-5, atol=1e-5), (out, ref)

    # Case 1b: default gamma=0 path (loss == mean NLL).
    out0 = jax.block_until_ready(focal_loss(logits, targets))
    ref0 = _focal_loss_ref(logits, targets, gamma=0.0)
    assert jnp.allclose(out0, ref0, rtol=1e-5, atol=1e-5), (out0, ref0)

    # Case 2: bf16 logits, ragged N, forced small tile -> exercises the
    # pipelined multi-tile path, the 2-way core split, and row masking.
    N2, C2 = 50, 128
    logits2 = jax.random.normal(k3, (N2, C2), dtype=jnp.bfloat16)
    targets2 = jax.random.randint(k4, (N2,), 0, C2, dtype=jnp.int32)
    out2 = jax.block_until_ready(
        focal_loss(logits2, targets2, gamma=gamma, tile_n=16))
    ref2 = _focal_loss_ref(logits2, targets2, gamma=gamma)
    assert jnp.allclose(out2, ref2, rtol=1e-4, atol=1e-4), (out2, ref2)

    # Case 3: C > chunk width -> exercises the grid-tiled class dimension with
    # online logsumexp (one full 1024-wide chunk + a masked partial chunk).
    N3, C3 = 16, 1536
    logits3 = jax.random.normal(k5, (N3, C3), dtype=jnp.float32)
    targets3 = jax.random.randint(k6, (N3,), 0, C3, dtype=jnp.int32)
    out3 = jax.block_until_ready(focal_loss(logits3, targets3, gamma=gamma))
    ref3 = _focal_loss_ref(logits3, targets3, gamma=gamma)
    assert jnp.allclose(out3, ref3, rtol=1e-5, atol=1e-5), (out3, ref3)

    print("KERNEL_OK")
</pallas_src>

<mosaic_0001>
module attributes {stable_mosaic.version = 11 : i64} {
  func.func @_focal_loss_kernel(%arg0: i32, %arg1: i32, %arg2: i32, %arg3: memref<8x16xf32, #tpu.memory_space<vmem>>, %arg4: memref<8x1xi32, #tpu.memory_space<vmem>>, %arg5: memref<1x1x1xf32, #tpu.memory_space<vmem>>, %arg6: memref<1x1xf32, #tpu.memory_space<vmem>>, %arg7: memref<8x1xf32, #tpu.memory_space<vmem>>, %arg8: memref<8x1xf32, #tpu.memory_space<vmem>>, %arg9: memref<8x1xf32, #tpu.memory_space<vmem>>) attributes {dimension_semantics = [#tpu.dimension_semantics<parallel>, #tpu.dimension_semantics<arbitrary>, #tpu.dimension_semantics<arbitrary>], iteration_bounds = array<i64: 1, 1, 1>, scalar_prefetch = 0 : i64, scratch_operands = 4 : i64, tpu.core_type = #tpu.core_type<tc>, window_params = [{transform_indices = @transform_0, window_bounds = array<i64: 8, 16>}, {transform_indices = @transform_1, window_bounds = array<i64: 8, 1>}, {transform_indices = @transform_2, window_bounds = array<i64: 1, 1, 1>}]} {
    %c0_i32 = arith.constant 0 : i32
    %0 = arith.cmpi eq, %arg1, %c0_i32 : i32
    %c0_i32_0 = arith.constant 0 : i32
    %1 = arith.cmpi eq, %arg2, %c0_i32_0 : i32
    %2 = arith.andi %0, %1 : i1
    %3 = arith.extui %2 : i1 to i32
    %c0_i32_1 = arith.constant 0 : i32
    %4 = arith.cmpi ne, %3, %c0_i32_1 : i32
    scf.if %4 {
      %cst_13 = arith.constant 0.000000e+00 : f32
      %33 = vector.broadcast %cst_13 : f32 to vector<1x1xf32>
      %c0_14 = arith.constant 0 : index
      %c0_15 = arith.constant 0 : index
      %34 = vector.load %arg6[%c0_14, %c0_15] : memref<1x1xf32, #tpu.memory_space<vmem>>, vector<1x1xf32>
      tpu.vector_store %arg6[%c0_14, %c0_15], %33 {strides = array<i32>} : memref<1x1xf32, #tpu.memory_space<vmem>>, vector<1x1xf32>,
    } else {
    }
    %c0 = arith.constant 0 : index
    %c0_2 = arith.constant 0 : index
    %5 = vector.load %arg3[%c0, %c0_2] : memref<8x16xf32, #tpu.memory_space<vmem>>, vector<8x16xf32>
    %c0_3 = arith.constant 0 : index
    %c0_4 = arith.constant 0 : index
    %6 = vector.load %arg4[%c0_3, %c0_4] : memref<8x1xi32, #tpu.memory_space<vmem>>, vector<8x1xi32>
    %7 = tpu.iota {dimensions = array<i32: 1>} : vector<8x16xi32>
    %c16_i32 = arith.constant 16 : i32
    %8 = arith.muli %arg2, %c16_i32 : i32
    %9 = vector.broadcast %8 : i32 to vector<8x16xi32>
    %10 = arith.addi %7, %9 : vector<8x16xi32>
    %11 = vector.broadcast %6 : vector<8x1xi32> to vector<8x16xi32>
    %12 = arith.cmpi eq, %10, %11 : vector<8x16xi32>
    %c0_i32_5 = arith.constant 0 : i32
    %13 = arith.sitofp %c0_i32_5 : i32 to f32
    %14 = vector.broadcast %13 : f32 to vector<8x16xf32>
    %15 = arith.select %12, %5, %14 : vector<8x16xi1>, vector<8x16xf32>
    %cst = arith.constant dense<0.000000e+00> : vector<8xf32>
    %16 = vector.multi_reduction <add>, %15, %cst [1] : vector<8x16xf32> to vector<8xf32>
    %17 = vector.shape_cast %16 : vector<8xf32> to vector<8x1xf32>
    %cst_6 = arith.constant dense<0xFF800000> : vector<8xf32>
    %18 = vector.multi_reduction <maximumf>, %5, %cst_6 [1] : vector<8x16xf32> to vector<8xf32>
    %19 = vector.shape_cast %18 : vector<8xf32> to vector<8x1xf32>
    %20 = vector.broadcast %19 : vector<8x1xf32> to vector<8x16xf32>
    %21 = arith.subf %5, %20 : vector<8x16xf32>
    %22 = math.exp %21 : vector<8x16xf32>
    %cst_7 = arith.constant dense<0.000000e+00> : vector<8xf32>
    %23 = vector.multi_reduction <add>, %22, %cst_7 [1] : vector<8x16xf32> to vector<8xf32>
    %24 = vector.shape_cast %23 : vector<8xf32> to vector<8x1xf32>
    %c0_i32_8 = arith.constant 0 : i32
    %25 = arith.cmpi eq, %arg2, %c0_i32_8 : i32
    %26 = arith.extui %25 : i1 to i32
    %c0_i32_9 = arith.constant 0 : i32
    %27 = arith.cmpi ne, %26, %c0_i32_9 : i32
    scf.if %27 {
      %33 = math.log %24 : vector<8x1xf32>
      %34 = arith.addf %33, %19 : vector<8x1xf32>
      %35 = arith.subf %34, %17 : vector<8x1xf32>
      %c0_13 = arith.constant 0 : index
      %c0_14 = arith.constant 0 : index
      %36 = vector.load %arg6[%c0_13, %c0_14] : memref<1x1xf32, #tpu.memory_space<vmem>>, vector<1x1xf32>
      %cst_15 = arith.constant dense<0.000000e+00> : vector<1xf32>
      %37 = vector.multi_reduction <add>, %35, %cst_15 [0] : vector<8x1xf32> to vector<1xf32>
      %38 = vector.shape_cast %37 : vector<1xf32> to vector<1x1xf32>
      %39 = arith.addf %36, %38 : vector<1x1xf32>
      %c0_16 = arith.constant 0 : index
      %c0_17 = arith.constant 0 : index
      %40 = vector.load %arg6[%c0_16, %c0_17] : memref<1x1xf32, #tpu.memory_space<vmem>>, vector<1x1xf32>
      tpu.vector_store %arg6[%c0_16, %c0_17], %39 {strides = array<i32>} : memref<1x1xf32, #tpu.memory_space<vmem>>, vector<1x1xf32>,
    } else {
    }
    %c0_i32_10 = arith.constant 0 : i32
    %28 = arith.cmpi eq, %arg1, %c0_i32_10 : i32
    %c0_i32_11 = arith.constant 0 : i32
    %29 = arith.cmpi eq, %arg2, %c0_i32_11 : i32
    %30 = arith.andi %28, %29 : i1
    %31 = arith.extui %30 : i1 to i32
    %c0_i32_12 = arith.constant 0 : i32
    %32 = arith.cmpi ne, %31, %c0_i32_12 : i32
    scf.if %32 {
      %c0_13 = arith.constant 0 : index
      %c0_14 = arith.constant 0 : index
      %33 = vector.load %arg6[%c0_13, %c0_14] : memref<1x1xf32, #tpu.memory_space<vmem>>, vector<1x1xf32>
      %34 = vector.shape_cast %33 : vector<1x1xf32> to vector<1x1x1xf32>
      %c0_15 = arith.constant 0 : index
      %c0_16 = arith.constant 0 : index
      %c0_17 = arith.constant 0 : index
      %35 = vector.load %arg5[%c0_15, %c0_16, %c0_17] : memref<1x1x1xf32, #tpu.memory_space<vmem>>, vector<1x1x1xf32>
      tpu.vector_store %arg5[%c0_15, %c0_16, %c0_17], %34 {strides = array<i32>} : memref<1x1x1xf32, #tpu.memory_space<vmem>>, vector<1x1x1xf32>,
    } else {
    }
    return
  }
  func.func @transform_0(%arg0: i32, %arg1: i32, %arg2: i32) -> (i32, i32) {
    %c1_i32 = arith.constant 1 : i32
    %0 = arith.muli %arg0, %c1_i32 : i32
    %1 = arith.addi %0, %arg1 : i32
    %c0_i32 = arith.constant 0 : i32
    %2 = arith.minsi %1, %c0_i32 : i32
    %c0_i32_0 = arith.constant 0 : i32
    return %2, %arg2 : i32, i32
  }
  func.func @transform_1(%arg0: i32, %arg1: i32, %arg2: i32) -> (i32, i32) {
    %c1_i32 = arith.constant 1 : i32
    %0 = arith.muli %arg0, %c1_i32 : i32
    %1 = arith.addi %0, %arg1 : i32
    %c0_i32 = arith.constant 0 : i32
    %2 = arith.minsi %1, %c0_i32 : i32
    %c0_i32_0 = arith.constant 0 : i32
    %c0_i32_1 = arith.constant 0 : i32
    return %2, %c0_i32_0 : i32, i32
  }
  func.func @transform_2(%arg0: i32, %arg1: i32, %arg2: i32) -> (i32, i32, i32) {
    %c0_i32 = arith.constant 0 : i32
    %c0_i32_0 = arith.constant 0 : i32
    %c0_i32_1 = arith.constant 0 : i32
    return %arg0, %c0_i32, %c0_i32_0 : i32, i32, i32
  }
}

</mosaic_0001>

<bundles_post_ra>
// kernel: tpu_custom_call.1
= control target key start
LH: loop header
LB: loop body
LE: loop exit
PB: predicated region body
PF: predicated region fallthrough
CT: control target
= control target key end

     0   :  { %vm86_vm0 = vcmask 130048   ;;  %s221_s0 = inlined_call_operand.vmem [shape: f32[8,16], index: 0, kind: input, shape index: {}]   ;;  %s222_s1 = inlined_call_operand.vmem [shape: s32[8,1], index: 1, kind: input, shape index: {}]   ;;  %s223_s2 = inlined_call_operand.hbm [shape: f32[1,1,1], index: 2, kind: output, shape index: {}]  }
   0x1   :  { %v74_v0 = vld [vmem:[%s221_s0] sm:$0xff] }
   0x2   :  { %7 = vsyncpa [#allocation7], 0  ;;  %v90_v1 = vsel %vm86_vm0, %v74_v0, -inf  ;;  %v179_v2 = vmov 0   ;;  %v75_v3 = vld [vmem:[%s222_s1] sm:$0xff]  ;;  %v76_v7 = vlaneseq  ;;  %vm72_vm2 = vcmask 0  }
   0x3   :  { %150 = vset.pattern.permute.xlu0 %v179_v2  ;;  %v180_v14 = vmov 0.0   ;;  %s181_s0 = smov [#allocation6]  }
   0x4   :  { %91 = vmax.xlane.f32.xlu0 %v90_v1  ;;  %v77_v8 = vand.u32 127, %v76_v7  ;;  %73 = vst.msk [vmem:[#allocation2] sm:$0x1] %vm72_vm2, %v180_v14  ;;  %s127_s1 = sshll.u32 %s181_s0, 4  ;;  %s128_s1 = int_to_ptr.vmem [resolvable:$true] %s127_s1 }
   0x5   :  { %s155_s13 = scalar_lea.vmem %s128_s1, 16  ;;  %s159_s14 = scalar_lea.vmem %s128_s1, 32 }
   0x6   :  { %p156_p0 = scmp.ne.s32.totalorder %s128_s1, %s155_s13  ;;  %p160_p1 = scmp.lt.s32.totalorder %s128_s1, %s128_s1 }
   0x7   :  { %p161_p2 = scmp.lt.s32.totalorder %s159_s14, %s155_s13 }
   0x9   :  { %p162_p3 = por %p161_p2, %p160_p1 }
   0xb   :  { %v106_v26 = vld [vmem:[#allocation2] sm:$0x1]  ;;  %p163_p4 = pnand %p162_p3, %p156_p0 }
  0x1a   :  { %82 = vperm.xlu0 %150, %v75_v3  }
  0x91   :  { %v92_v4 = vpop.xlane.xlu0 %91 }
  0x92   :  { %v93_v5 = vsub.f32 %v74_v0, %v92_v4 }
  0x94   :  { %v94_v6 = vmul.f32 1.442695, %v93_v5 }
  0x96   :  { %151 = vpow2.f32 %v94_v6 }
  0x99   :  { %v83_v9 = vpop.permute.xlu0 %82 }
  0x9a   :  { %vm84_vm1 = vcmp.eq.s32.totalorder %v77_v8, %v83_v9 }
  0x9b   :  { %v85_v11 = vsel %vm84_vm1, %v74_v0, 0.0 }
  0x9c   :  { %v87_v13 = vsel %vm86_vm0, %v85_v11, 0.0 }
  0xa0   :  { %v152_v10 = vpop.eup %151 }
  0xa1   :  { %v96_v12 = vsel %vm86_vm0, %v152_v10, 0.0 }
  0xa2   :  { %97 = vadd.xlane.f32.xlu1 %v96_v12 }
  0xa6   :  { %88 = vadd.xlane.f32.xlu1 %v87_v13 }
 0x12f   :  { %v98_v15 = vpop.xlane.xlu1 %97 }
 0x130   :  { %153 = vlog2.f32 %v98_v15 }
 0x133   :  { %v89_v18 = vpop.xlane.xlu1 %88 }
 0x13a   :  { %v154_v16 = vpop.eup %153 }
 0x13b   :  { %v103_v17 = vmul.f32 0.6931472, %v154_v16 }
 0x13d   :  { %v104_v19 = vadd.f32 %v103_v17, %v92_v4 }
 0x13f   :  { %v105_v20 = vsub.f32 %v104_v19, %v89_v18 }
 0x141   :  { %v107_v21 = vrot.slane %v105_v20, 4 }
 0x143   :  { %v108_v22 = vadd.f32 %v107_v21, %v105_v20 }
 0x145   :  { %v109_v23 = vrot.slane %v108_v22, 2 }
 0x147   :  { %v110_v24 = vadd.f32 %v109_v23, %v108_v22 }
 0x149   :  { %v111_v25 = vrot.slane %v110_v24, 1 }
 0x14b   :  { %v112_v27 = vadd.f32 %v111_v25, %v110_v24 }
 0x14d   :  { %v113_v28 = vadd.f32 %v112_v27, %v106_v26 }
 0x14f   :  { %115 = vst.msk [vmem:[#allocation2] sm:$0x1] %vm72_vm2, %v113_v28 }
 0x156   :  { %v118_v29 = vld [vmem:[#allocation2] sm:$0x1] }
 0x157   :  { %120 = vst.msk [vmem:[#allocation6] sm:$0x1] %vm72_vm2, %v118_v29 }
 0x158   :  { %166 = shalt.err (!%p163_p4)
}
 0x159   :  { %s167_s17 = scalar_lea.hbm %s223_s2, 16 }
 0x15a   :  { %p168_p5 = scmp.ne.s32.totalorder %s223_s2, %s167_s17  ;;  %p171_p6 = scmp.lt.u32.totalorder %s167_s17, %s223_s2 }
 0x15c   :  { %p173_p7 = pnand %p171_p6, %p168_p5 }
 0x15e   :  { %176 = shalt.err (!%p173_p7)
}
 0x15f   :  { %130 = dma.vmem_to_hbm [thread:$0]  %s128_s1, 16, %s223_s2, [#allocation7]  }
 0x160   :  { %177 = dma.done.wait [#allocation7], 16  }
 0x161   :  { %178 = vsyncadd [#allocation7], 4294967280 }
 0x162   :  { %134 = vsyncpa [#allocation7], 1 }

</bundles_post_ra>
